<compile_context>
chip_gen: v5e
topology: v5e:2x2
jax: 0.10.0
libtpu: 0.0.40
codegen_flags: <defaults>
</compile_context>

<pallas_src>
import jax
import jax.numpy as jnp
from jax.experimental import pallas as pl
from jax.experimental.pallas import tpu as pltpu

_LANES = 128
_MAX_TILE_ROWS = 1024  # (1024,128) f32 = 512 KiB/buffer; x2 inputs x2 bufs = 2 MiB VMEM


def _sublane_multiple(dtype) -> int:
    # Minimum sublane tiling for packed dtypes: f32 -> 8, bf16/f16 -> 16, int8/fp8 -> 32.
    itemsize = jnp.dtype(dtype).itemsize
    return 8 * max(1, 4 // itemsize)


def _l1_sum_kernel(gt_ref, fused_ref, out_ref, acc_ref):
    """Accumulate |fused - gt| into a tile-shaped f32 VMEM accumulator."""

    @pl.when(pl.program_id(0) == 0)
    def _init():
        acc_ref[...] = jnp.zeros_like(acc_ref)

    # Native-dtype load, in-vreg upcast; inner loop is load / sub / abs / add (VPU only).
    diff = fused_ref[...].astype(jnp.float32) - gt_ref[...].astype(jnp.float32)
    acc_ref[...] += jnp.abs(diff)

    @pl.when(pl.program_id(0) == pl.num_programs(0) - 1)
    def _finalize():
        # Single cross-lane/sublane reduction, done once at the very end.
        out_ref[...] = jnp.sum(acc_ref[...]).reshape(1, 1)


def _l1_abs_sum(gt2d: jax.Array, fused2d: jax.Array, tile_rows: int) -> jax.Array:
    """Sum of |fused - gt| over a (rows, 128) slab, rows % tile_rows == 0."""
    rows = gt2d.shape[0]
    assert rows % tile_rows == 0 and rows > 0
    grid = (rows // tile_rows,)
    n_main = rows * _LANES
    itemsize = jnp.dtype(gt2d.dtype).itemsize

    out = pl.pallas_call(
        _l1_sum_kernel,
        out_shape=jax.ShapeDtypeStruct((1, 1), jnp.float32),
        grid_spec=pltpu.PrefetchScalarGridSpec(
            num_scalar_prefetch=0,
            grid=grid,
            in_specs=[
                pl.BlockSpec((tile_rows, _LANES), lambda i: (i, 0)),
                pl.BlockSpec((tile_rows, _LANES), lambda i: (i, 0)),
            ],
            out_specs=pl.BlockSpec((1, 1), lambda i: (0, 0)),
            scratch_shapes=[pltpu.VMEM((tile_rows, _LANES), jnp.float32)],
        ),
        compiler_params=pltpu.CompilerParams(
            dimension_semantics=("arbitrary",),  # reduction axis: acc/out stay resident
        ),
        cost_estimate=pl.CostEstimate(
            flops=3 * n_main,
            transcendentals=0,
            bytes_accessed=2 * n_main * itemsize + 4,
        ),
    )(gt2d, fused2d)
    return out[0, 0]


def l_intensity(image_GT: jax.Array, image_fused: jax.Array,
                max_tile_rows: int = _MAX_TILE_ROWS) -> jax.Array:
    """Pallas equivalent of L_Intensity.forward: 1 * F.l1_loss(image_fused, image_GT)."""
    assert image_GT.shape == image_fused.shape
    assert image_GT.dtype == image_fused.dtype
    n = image_GT.size

    gt = image_GT.reshape(-1)
    fused = image_fused.reshape(-1)

    rows_total = n // _LANES
    sub = _sublane_multiple(gt.dtype)
    # Largest legal tile: multiple of the sublane packing, capped by max_tile_rows and rows.
    tile_rows = (min(max_tile_rows, rows_total) // sub) * sub

    total = jnp.float32(0.0)
    main_elems = 0
    if tile_rows > 0:
        num_blocks = rows_total // tile_rows
        main_elems = num_blocks * tile_rows * _LANES
        gt_main = gt[:main_elems].reshape(-1, _LANES)
        fused_main = fused[:main_elems].reshape(-1, _LANES)
        total = _l1_abs_sum(gt_main, fused_main, tile_rows)

    # Ragged tail (< tile_rows*128 elements): tiny pure-JAX sum, no full-array padding.
    if main_elems < n:
        tail = jnp.sum(
            jnp.abs(fused[main_elems:].astype(jnp.float32)
                    - gt[main_elems:].astype(jnp.float32)))
        total = total + tail

    return total / jnp.float32(n)  # mean reduction of F.l1_loss


if __name__ == "__main__":
    key = jax.random.PRNGKey(0)
    k1, k2, k3, k4 = jax.random.split(key, 4)

    # Primary check: NCHW f32 images, consistent with the PyTorch module's usage.
    image_GT = jax.random.uniform(k1, (2, 4, 16, 16), dtype=jnp.float32)
    image_fused = jax.random.uniform(k2, (2, 4, 16, 16), dtype=jnp.float32)
    loss = l_intensity(image_GT, image_fused)
    jax.block_until_ready(loss)
    ref = jnp.mean(jnp.abs(image_fused - image_GT))
    assert jnp.allclose(loss, ref, rtol=1e-6, atol=1e-6), (loss, ref)

    # Multi-step grid path: force several grid iterations through the accumulator.
    loss_multi = l_intensity(image_GT, image_fused, max_tile_rows=8)
    jax.block_until_ready(loss_multi)
    assert jnp.allclose(loss_multi, ref, rtol=1e-6, atol=1e-6), (loss_multi, ref)

    # bf16 inputs with a ragged tail: kernel streams bf16 directly (upcast in-vreg),
    # tail (non-tile-aligned remainder) handled by the pure-JAX path.
    gt_bf16 = jax.random.uniform(k3, (2, 3, 33, 33), dtype=jnp.float32).astype(jnp.bfloat16)
    fused_bf16 = jax.random.uniform(k4, (2, 3, 33, 33), dtype=jnp.float32).astype(jnp.bfloat16)
    loss_bf16 = l_intensity(gt_bf16, fused_bf16)
    jax.block_until_ready(loss_bf16)
    ref_bf16 = jnp.mean(jnp.abs(fused_bf16.astype(jnp.float32) - gt_bf16.astype(jnp.float32)))
    assert jnp.allclose(loss_bf16, ref_bf16, rtol=1e-5, atol=1e-6), (loss_bf16, ref_bf16)

    print("KERNEL_OK")
</pallas_src>

<mosaic_0001>
module attributes {stable_mosaic.version = 11 : i64} {
  func.func @_l1_sum_kernel(%arg0: i32, %arg1: memref<16x128xf32, #tpu.memory_space<vmem>>, %arg2: memref<16x128xf32, #tpu.memory_space<vmem>>, %arg3: memref<1x1xf32, #tpu.memory_space<vmem>>, %arg4: memref<16x128xf32, #tpu.memory_space<vmem>>) attributes {dimension_semantics = [#tpu.dimension_semantics<arbitrary>], iteration_bounds = array<i64: 1>, scalar_prefetch = 0 : i64, scratch_operands = 1 : i64, tpu.core_type = #tpu.core_type<tc>, window_params = [{transform_indices = @transform_0, window_bounds = array<i64: 16, 128>}, {transform_indices = @transform_1, window_bounds = array<i64: 16, 128>}, {pipeline_mode = #tpu.pipeline_mode<synchronous>, transform_indices = @transform_2, window_bounds = array<i64: 1, 1>}]} {
    %c0_i32 = arith.constant 0 : i32
    %0 = arith.cmpi eq, %arg0, %c0_i32 : i32
    %1 = arith.extui %0 : i1 to i32
    %c0_i32_0 = arith.constant 0 : i32
    %2 = arith.cmpi ne, %1, %c0_i32_0 : i32
    scf.if %2 {
      %cst = arith.constant 0.000000e+00 : f32
      %13 = vector.broadcast %cst : f32 to vector<16x128xf32>
      %c0_10 = arith.constant 0 : index
      %c0_11 = arith.constant 0 : index
      %14 = vector.load %arg4[%c0_10, %c0_11] : memref<16x128xf32, #tpu.memory_space<vmem>>, vector<16x128xf32>
      tpu.vector_store %arg4[%c0_10, %c0_11], %13 {strides = array<i32>} : memref<16x128xf32, #tpu.memory_space<vmem>>, vector<16x128xf32>,
    } else {
    }
    %c0 = arith.constant 0 : index
    %c0_1 = arith.constant 0 : index
    %3 = vector.load %arg2[%c0, %c0_1] : memref<16x128xf32, #tpu.memory_space<vmem>>, vector<16x128xf32>
    %c0_2 = arith.constant 0 : index
    %c0_3 = arith.constant 0 : index
    %4 = vector.load %arg1[%c0_2, %c0_3] : memref<16x128xf32, #tpu.memory_space<vmem>>, vector<16x128xf32>
    %5 = arith.subf %3, %4 : vector<16x128xf32>
    %c0_4 = arith.constant 0 : index
    %c0_5 = arith.constant 0 : index
    %6 = vector.load %arg4[%c0_4, %c0_5] : memref<16x128xf32, #tpu.memory_space<vmem>>, vector<16x128xf32>
    %7 = math.absf %5 : vector<16x128xf32>
    %8 = arith.addf %6, %7 : vector<16x128xf32>
    %c0_6 = arith.constant 0 : index
    %c0_7 = arith.constant 0 : index
    %9 = vector.load %arg4[%c0_6, %c0_7] : memref<16x128xf32, #tpu.memory_space<vmem>>, vector<16x128xf32>
    tpu.vector_store %arg4[%c0_6, %c0_7], %8 {strides = array<i32>} : memref<16x128xf32, #tpu.memory_space<vmem>>, vector<16x128xf32>,
    %c0_i32_8 = arith.constant 0 : i32
    %10 = arith.cmpi eq, %arg0, %c0_i32_8 : i32
    %11 = arith.extui %10 : i1 to i32
    %c0_i32_9 = arith.constant 0 : i32
    %12 = arith.cmpi ne, %11, %c0_i32_9 : i32
    scf.if %12 {
      %c0_10 = arith.constant 0 : index
      %c0_11 = arith.constant 0 : index
      %13 = vector.load %arg4[%c0_10, %c0_11] : memref<16x128xf32, #tpu.memory_space<vmem>>, vector<16x128xf32>
      %14 = vector.shape_cast %13 : vector<16x128xf32> to vector<1x16x128xf32>
      %cst = arith.constant dense<0.000000e+00> : vector<1xf32>
      %15 = vector.multi_reduction <add>, %14, %cst [1, 2] : vector<1x16x128xf32> to vector<1xf32>
      %16 = vector.shape_cast %15 : vector<1xf32> to vector<1x1x1xf32>
      %17 = vector.extract %16[0, 0, 0] : f32 from vector<1x1x1xf32>
      %18 = vector.broadcast %17 : f32 to vector<1x1xf32>
      %c0_12 = arith.constant 0 : index
      %c0_13 = arith.constant 0 : index
      %19 = vector.load %arg3[%c0_12, %c0_13] : memref<1x1xf32, #tpu.memory_space<vmem>>, vector<1x1xf32>
      tpu.vector_store %arg3[%c0_12, %c0_13], %18 {strides = array<i32>} : memref<1x1xf32, #tpu.memory_space<vmem>>, vector<1x1xf32>,
    } else {
    }
    return
  }
  func.func @transform_0(%arg0: i32) -> (i32, i32) {
    %c0_i32 = arith.constant 0 : i32
    %c0_i32_0 = arith.constant 0 : i32
    return %arg0, %c0_i32 : i32, i32
  }
  func.func @transform_1(%arg0: i32) -> (i32, i32) {
    %c0_i32 = arith.constant 0 : i32
    %c0_i32_0 = arith.constant 0 : i32
    return %arg0, %c0_i32 : i32, i32
  }
  func.func @transform_2(%arg0: i32) -> (i32, i32) {
    %c0_i32 = arith.constant 0 : i32
    %c0_i32_0 = arith.constant 0 : i32
    %c0_i32_1 = arith.constant 0 : i32
    return %c0_i32, %c0_i32_0 : i32, i32
  }
}

</mosaic_0001>

<bundles_post_ra>
// kernel: tpu_custom_call.1
= control target key start
LH: loop header
LB: loop body
LE: loop exit
PB: predicated region body
PF: predicated region fallthrough
CT: control target
= control target key end

     0   :  { %7 = vsyncpa [#allocation4], 0  ;;  %s214_s0 = inlined_call_operand.hbm [shape: f32[16,128], index: 0, kind: input, shape index: {}]   ;;  %s215_s1 = inlined_call_operand.hbm [shape: f32[16,128], index: 1, kind: input, shape index: {}]   ;;  %s216_s2 = inlined_call_operand.hbm [shape: f32[1,1], index: 2, kind: output, shape index: {}]  }
   0x1   :  { %8 = vsyncpa [#allocation7], 0 }
   0x2   :  { %9 = vsyncpa [#allocation5], 0  ;;  %s14_s11 = sshll.u32 %s214_s0, 4  ;;  %s185_s12 = smov [#allocation3]   ;;  %s15_s11 = int_to_ptr.hbm [resolvable:$true] %s14_s11 }
   0x3   :  { %s16_s13 = sshll.u32 %s185_s12, 4  ;;  %s27_s16 = sshll.u32 %s215_s1, 4  ;;  %s17_s13 = int_to_ptr.vmem [resolvable:$true] %s16_s13  ;;  %s28_s16 = int_to_ptr.hbm [resolvable:$true] %s27_s16 }
   0x4   :  { %s186_s17 = smov 128   ;;  %s187_s18 = smov 8  }
   0x5   :  { %22 = dma.hbm_to_vmem [thread:$0]  %s15_s11, 256, %s17_s13, [#allocation4], %s186_s17, %s186_s17, %s187_s18  }
   0x6   :  { %s188_s19 = smov [#allocation6]  }
   0x7   :  { %s29_s20 = sshll.u32 %s188_s19, 4  ;;  %s30_s20 = int_to_ptr.vmem [resolvable:$true] %s29_s20 }
   0x8   :  { %35 = dma.hbm_to_vmem [thread:$0]  %s28_s16, 256, %s30_s20, [#allocation7], %s186_s17, %s186_s17, %s187_s18  }
   0x9   :  { %179 = dma.done.wait [#allocation4], 256  }
   0xa   :  { %180 = vsyncadd [#allocation4], 4294967040 }
   0xb   :  { %181 = dma.done.wait [#allocation7], 256  }
   0xc   :  { %182 = vsyncadd [#allocation7], 4294967040  ;;  %v50_v0 = vld [vmem:[#allocation6] sm:$0xff]  ;;  %v51_v1 = vld [vmem:[#allocation6 + $0x8] sm:$0xff]  ;;  %s189_s0 = smov [#allocation8]   ;;  %s89_s23 = sshll.u32 %s216_s2, 4  ;;  %s90_s23 = int_to_ptr.hbm [resolvable:$true] %s89_s23 }
   0xd   :  { %v52_v2 = vld [vmem:[#allocation3] sm:$0xff]  ;;  %v53_v3 = vld [vmem:[#allocation3 + $0x8] sm:$0xff]  ;;  %s87_s1 = sshll.u32 %s189_s0, 4  ;;  %vm80_vm0 = vcmask 0   ;;  %s88_s1 = int_to_ptr.vmem [resolvable:$true] %s87_s1 }
   0xe   :  { %v54_v4 = vsub.f32 %v50_v0, %v52_v2  ;;  %v55_v5 = vsub.f32 %v51_v1, %v53_v3 }
  0x10   :  { %v58_v6 = vand.u32 2147483647, %v54_v4  ;;  %v59_v7 = vand.u32 2147483647, %v55_v5 }
  0x12   :  { %v69_v8 = vadd.f32 %v59_v7, %v58_v6 }
  0x14   :  { %70 = vadd.xlane.f32.xlu0 %v69_v8 }
  0x87   :  { %v71_v9 = vpop.xlane.xlu0 %70 }
  0x88   :  { %v72_v10 = vrot.slane %v71_v9, 4 }
  0x8a   :  { %v73_v11 = vadd.f32 %v72_v10, %v71_v9 }
  0x8c   :  { %v74_v12 = vrot.slane %v73_v11, 2 }
  0x8e   :  { %v75_v13 = vadd.f32 %v74_v12, %v73_v11 }
  0x90   :  { %v76_v14 = vrot.slane %v75_v13, 1 }
  0x92   :  { %v77_v15 = vadd.f32 %v76_v14, %v75_v13 }
  0x94   :  { %100 = vpush %v77_v15 }
  0xc5   :  { %s101_s24 = spop %100 }
  0xc6   :  { %v79_v16 = vstv %s101_s24 }
  0xc7   :  { %81 = vst.msk [vmem:[#allocation8] sm:$0x1] %vm80_vm0, %v79_v16 }
  0xc8   :  { %92 = dma.vmem_to_hbm [thread:$0]  %s88_s1, 16, %s90_s23, [#allocation5]  }
  0xc9   :  { %183 = dma.done.wait [#allocation5], 16  }
  0xca   :  { %184 = vsyncadd [#allocation5], 4294967280 }
  0xcb   :  { %97 = vsyncpa [#allocation4], 1 }
  0xcc   :  { %98 = vsyncpa [#allocation7], 1 }
  0xcd   :  { %99 = vsyncpa [#allocation5], 1 }

</bundles_post_ra>
